<compile_context>
chip_gen: v6e
topology: v6e:2x2x1
jax: 0.10.0
libtpu: 0.0.40
codegen_flags: <defaults>
</compile_context>

<pallas_src>
import functools

import jax
import jax.numpy as jnp
from jax import lax
from jax.experimental import pallas as pl
from jax.experimental.pallas import tpu as pltpu

EPS = 1e-5
KS = 3  # kernel_size


def _instance_norm(h, inv_hw):
    """InstanceNorm2d (affine=False) over the flattened-spatial (lane) axis.

    Single reduction pass in f32: var = E[h^2] - E[h]^2 (biased, as PyTorch).
    """
    mean = jnp.sum(h, axis=1, keepdims=True) * inv_hw
    mean_sq = jnp.sum(h * h, axis=1, keepdims=True) * inv_hw
    var = mean_sq - mean * mean
    return (h - mean) * lax.rsqrt(var + EPS)


def _make_tap_masks(H, W):
    """Per-tap (1, H*W) bool validity masks, built in-kernel from iota.

    None means the tap needs no masking (center tap; and dy==0 / dx==0
    directions only need the horizontal / vertical part respectively).
    """
    HW = H * W
    flat = lax.broadcasted_iota(jnp.int32, (1, HW), 1)
    xcol = flat % W
    top_ok = flat >= W           # source row y-1 is inside   (dy = -1)
    bot_ok = flat < HW - W       # source row y+1 is inside   (dy = +1)
    left_ok = xcol != 0          # source col x-1 is inside   (dx = -1)
    right_ok = xcol != W - 1     # source col x+1 is inside   (dx = +1)

    masks = []
    for dy in (-1, 0, 1):
        vert = top_ok if dy == -1 else (bot_ok if dy == 1 else None)
        for dx in (-1, 0, 1):
            horiz = left_ok if dx == -1 else (right_ok if dx == 1 else None)
            if vert is None:
                masks.append(horiz)
            elif horiz is None:
                masks.append(vert)
            else:
                masks.append(jnp.logical_and(vert, horiz))
    return masks


def _conv3x3(src, w_ref, masks, W):
    """3x3 'same' conv as 9 accumulated tap matmuls.

    src    : (Cin, H*W) value in compute dtype (bf16 or f32)
    w_ref  : (9, Cout, Cin) Ref, tap order (dy, dx) row-major
    masks  : list of 9 (1, H*W) bool masks (or None) from _make_tap_masks
    returns: (Cout, H*W) f32 accumulator
    """
    HW = src.shape[1]
    acc = None
    t = 0
    for dy in (-1, 0, 1):
        # one band per dy (3 materializations instead of 9); dy shift via XLU roll
        band = src if dy == 0 else pltpu.roll(src, shift=(-dy * W) % HW, axis=1)
        for dx in (-1, 0, 1):
            tap = band if dx == 0 else pltpu.roll(band, shift=(-dx) % HW, axis=1)
            if masks[t] is not None:
                tap = jnp.where(masks[t], tap, jnp.zeros((), tap.dtype))
            contrib = lax.dot_general(
                w_ref[t], tap,
                dimension_numbers=(((1,), (0,)), ((), ())),
                preferred_element_type=jnp.float32)
            acc = contrib if acc is None else acc + contrib
            t += 1
    return acc


def resnet_block2_kernel(x_ref, w1_ref, w2_ref, o_ref, *, H, W, compute_dtype):
    HW = H * W
    inv_hw = 1.0 / HW
    masks = _make_tap_masks(H, W)        # hoisted once, reused by both convs

    # --- Conv2dBlock #1: conv3x3 -> InstanceNorm -> ReLU ---------------------
    # (bias omitted: exactly cancelled by InstanceNorm's mean subtraction)
    xc = x_ref[...].astype(compute_dtype)                       # (C, HW)
    h1 = _instance_norm(_conv3x3(xc, w1_ref, masks, W), inv_hw)  # f32
    h1 = jnp.maximum(h1, 0.0)

    # --- Conv2dBlock #2: conv3x3 -> InstanceNorm (no activation) -------------
    h2 = _instance_norm(_conv3x3(h1.astype(compute_dtype), w2_ref, masks, W),
                        inv_hw)                                  # (Cout, HW) f32

    # --- identity skip + residual add (x re-read here, f32, short live range)
    o_ref[...] = (x_ref[...].astype(jnp.float32) + h2).astype(o_ref.dtype)


def _vmem_limit_bytes(C, cmid, cout, HW, compute_itemsize):
    """Explicit VMEM budget: generous for the working set, but with headroom
    under v7x's 64 MiB physical VMEM and never below the v5e 16 MiB default."""
    f32 = 4
    io_blocks = 2 * (C + cout) * HW * f32 * 2                      # x/out, 2 buffers
    weights = 2 * KS * KS * (cmid * C + cout * cmid) * compute_itemsize * 2
    live_vals = (4 * max(C, cmid) * HW * compute_itemsize          # src/band/tap
                 + 3 * max(cmid, cout) * HW * f32)                 # acc / h1 / h2
    est = io_blocks + weights + live_vals + (4 << 20)
    return int(min(max(est, 16 << 20), 56 << 20))


def resnet_block2_forward(x_nchw, w1, b1, w2, b2, *, compute_dtype=jnp.bfloat16):
    """x_nchw: (N, C, H, W) float32.  Conv weights HWIO (kh, kw, Cin, Cout).

    b1/b2 are accepted (the PyTorch conv has bias=True) but unused: a
    per-channel bias before InstanceNorm2d(affine=False) is exactly cancelled
    by the mean subtraction, so adding it is dead work.
    """
    del b1, b2
    N, C, H, W = x_nchw.shape
    assert w1.shape[:3] == (KS, KS, C)
    cmid = w1.shape[3]
    assert w2.shape[:3] == (KS, KS, cmid)
    cout = w2.shape[3]
    assert cout == C, "identity skip requires out_channels == in_channels"
    HW = H * W

    # channels-first & contiguous -> this reshape is free (no HBM pass); last
    # (lane) dim is H*W, a multiple of 128 -> lane-dense unmasked stores.
    x_flat = x_nchw.reshape(N, C, HW)
    # weights: (kh, kw, ci, co) -> per-tap (9, co, ci); tap order (dy, dx)
    # row-major matches _conv3x3.  MXU operands in compute_dtype (bf16 default).
    w1_taps = jnp.transpose(w1.reshape(KS * KS, C, cmid), (0, 2, 1)).astype(compute_dtype)
    w2_taps = jnp.transpose(w2.reshape(KS * KS, cmid, cout), (0, 2, 1)).astype(compute_dtype)

    vmem_limit = _vmem_limit_bytes(C, cmid, cout, HW,
                                   jnp.dtype(compute_dtype).itemsize)

    out_flat = pl.pallas_call(
        functools.partial(resnet_block2_kernel, H=H, W=W,
                          compute_dtype=compute_dtype),
        out_shape=jax.ShapeDtypeStruct((N, cout, HW), x_nchw.dtype),
        grid_spec=pltpu.PrefetchScalarGridSpec(
            num_scalar_prefetch=0,
            grid=(N,),
            in_specs=[
                pl.BlockSpec((None, C, HW), lambda n: (n, 0, 0)),
                pl.BlockSpec((KS * KS, cmid, C), lambda n: (0, 0, 0)),
                pl.BlockSpec((KS * KS, cout, cmid), lambda n: (0, 0, 0)),
            ],
            out_specs=pl.BlockSpec((None, cout, HW), lambda n: (n, 0, 0)),
        ),
        # Batch axis is independent; on v7x switch to pltpu.CORE_PARALLEL if a
        # profile shows only one TensorCore active.
        compiler_params=pltpu.CompilerParams(
            dimension_semantics=("parallel",),
            vmem_limit_bytes=vmem_limit),
    )(x_flat, w1_taps, w2_taps)

    return out_flat.reshape(N, cout, H, W)


# ---------------------------- pure-JAX reference ----------------------------
def _ref_conv_block(x_nhwc, w, b, relu):
    y = lax.conv_general_dilated(
        x_nhwc, w, window_strides=(1, 1), padding=((1, 1), (1, 1)),
        dimension_numbers=("NHWC", "HWIO", "NHWC"))
    y = y + b.reshape(1, 1, 1, -1)
    mean = jnp.mean(y, axis=(1, 2), keepdims=True)
    var = jnp.mean((y - mean) ** 2, axis=(1, 2), keepdims=True)
    y = (y - mean) * lax.rsqrt(var + EPS)
    return jnp.maximum(y, 0.0) if relu else y


def resnet_block2_reference(x_nchw, w1, b1, w2, b2):
    x = jnp.transpose(x_nchw, (0, 2, 3, 1))
    h = _ref_conv_block(x, w1, b1, relu=True)
    h = _ref_conv_block(h, w2, b2, relu=False)
    return jnp.transpose(x + h, (0, 3, 1, 2))


# --------------------------------- main -------------------------------------
if __name__ == "__main__":
    N, C, H, W = 2, 4, 16, 16
    key = jax.random.PRNGKey(0)
    kx, kw1, kb1, kw2, kb2 = jax.random.split(key, 5)

    x = jax.random.normal(kx, (N, C, H, W), dtype=jnp.float32)
    # deterministic synthetic params (shapes match nn.Conv2d(C, C, 3, bias=True))
    w1 = jax.random.normal(kw1, (KS, KS, C, C), dtype=jnp.float32) * 0.1
    b1 = jax.random.normal(kb1, (C,), dtype=jnp.float32) * 0.1
    w2 = jax.random.normal(kw2, (KS, KS, C, C), dtype=jnp.float32) * 0.1
    b2 = jax.random.normal(kb2, (C,), dtype=jnp.float32) * 0.1

    ref = jax.block_until_ready(resnet_block2_reference(x, w1, b1, w2, b2))

    # exact-math check: f32 MXU operands
    out_f32 = jax.block_until_ready(
        resnet_block2_forward(x, w1, b1, w2, b2, compute_dtype=jnp.float32))
    assert out_f32.shape == (N, C, H, W)
    err_f32 = float(jnp.max(jnp.abs(out_f32 - ref)))
    assert jnp.allclose(out_f32, ref, atol=1e-4, rtol=1e-4), err_f32

    # performance path: bf16 MXU operands, f32 accumulation / stats / residual
    out_bf16 = jax.block_until_ready(resnet_block2_forward(x, w1, b1, w2, b2))
    assert out_bf16.shape == (N, C, H, W)
    err_bf16 = float(jnp.max(jnp.abs(out_bf16 - ref)))
    assert jnp.allclose(out_bf16, ref, atol=5e-2, rtol=5e-2), err_bf16

    print("KERNEL_OK")
</pallas_src>

<mosaic_0001>
module attributes {stable_mosaic.version = 11 : i64} {
  func.func @resnet_block2_kernel(%arg0: i32, %arg1: memref<1x4x256xf32, #tpu.memory_space<vmem>>, %arg2: memref<9x4x4xf32, #tpu.memory_space<vmem>>, %arg3: memref<9x4x4xf32, #tpu.memory_space<vmem>>, %arg4: memref<1x4x256xf32, #tpu.memory_space<vmem>>) attributes {dimension_semantics = [#tpu.dimension_semantics<parallel>], iteration_bounds = array<i64: 2>, scalar_prefetch = 0 : i64, scratch_operands = 0 : i64, tpu.core_type = #tpu.core_type<tc>, window_params = [{transform_indices = @transform_0, window_bounds = array<i64: 1, 4, 256>}, {pipeline_mode = #tpu.pipeline_mode<synchronous>, transform_indices = @transform_1, window_bounds = array<i64: 9, 4, 4>}, {pipeline_mode = #tpu.pipeline_mode<synchronous>, transform_indices = @transform_2, window_bounds = array<i64: 9, 4, 4>}, {transform_indices = @transform_3, window_bounds = array<i64: 1, 4, 256>}]} {
    %0 = tpu.iota {dimensions = array<i32: 1>} : vector<1x256xi32>
    %c16_i32 = arith.constant 16 : i32
    %c0_i32 = arith.constant 0 : i32
    %1 = arith.cmpi eq, %c16_i32, %c0_i32 : i32
    %c1_i32 = arith.constant 1 : i32
    %2 = arith.select %1, %c1_i32, %c16_i32 : i32
    %3 = vector.broadcast %2 : i32 to vector<1x256xi32>
    %4 = arith.remsi %0, %3 : vector<1x256xi32>
    %c0_i32_0 = arith.constant 0 : i32
    %5 = vector.broadcast %c0_i32_0 : i32 to vector<1x256xi32>
    %6 = arith.cmpi ne, %4, %5 : vector<1x256xi32>
    %c0_i32_1 = arith.constant 0 : i32
    %7 = vector.broadcast %c0_i32_1 : i32 to vector<1x256xi32>
    %8 = arith.cmpi slt, %4, %7 : vector<1x256xi32>
    %c0_i32_2 = arith.constant 0 : i32
    %9 = arith.cmpi slt, %2, %c0_i32_2 : i32
    %10 = vector.broadcast %9 : i1 to vector<1x256xi1>
    %11 = vector.broadcast %10 : vector<1x256xi1> to vector<1x256xi1>
    %12 = arith.xori %8, %11 : vector<1x256xi1>
    %13 = arith.andi %12, %6 : vector<1x256xi1>
    %14 = vector.broadcast %2 : i32 to vector<1x256xi32>
    %15 = arith.addi %4, %14 : vector<1x256xi32>
    %16 = arith.select %13, %15, %4 : vector<1x256xi1>, vector<1x256xi32>
    %c16_i32_3 = arith.constant 16 : i32
    %17 = vector.broadcast %c16_i32_3 : i32 to vector<1x256xi32>
    %18 = arith.cmpi sge, %0, %17 : vector<1x256xi32>
    %c240_i32 = arith.constant 240 : i32
    %19 = vector.broadcast %c240_i32 : i32 to vector<1x256xi32>
    %20 = arith.cmpi slt, %0, %19 : vector<1x256xi32>
    %c0_i32_4 = arith.constant 0 : i32
    %21 = vector.broadcast %c0_i32_4 : i32 to vector<1x256xi32>
    %22 = arith.cmpi ne, %16, %21 : vector<1x256xi32>
    %c15_i32 = arith.constant 15 : i32
    %23 = vector.broadcast %c15_i32 : i32 to vector<1x256xi32>
    %24 = arith.cmpi ne, %16, %23 : vector<1x256xi32>
    %25 = arith.andi %18, %22 : vector<1x256xi1>
    %26 = arith.andi %18, %24 : vector<1x256xi1>
    %27 = arith.andi %20, %22 : vector<1x256xi1>
    %28 = arith.andi %20, %24 : vector<1x256xi1>
    %c0 = arith.constant 0 : index
    %c0_5 = arith.constant 0 : index
    %c0_6 = arith.constant 0 : index
    %29 = vector.load %arg1[%c0, %c0_5, %c0_6] : memref<1x4x256xf32, #tpu.memory_space<vmem>>, vector<1x4x256xf32>
    %30 = vector.shape_cast %29 : vector<1x4x256xf32> to vector<4x256xf32>
    %c16_i32_7 = arith.constant 16 : i32
    %31 = tpu.dynamic_rotate %30 by %c16_i32_7 dim 1 : vector<4x256xf32>, i32 -> vector<4x256xf32>
    %c1_i32_8 = arith.constant 1 : i32
    %32 = tpu.dynamic_rotate %31 by %c1_i32_8 dim 1 : vector<4x256xf32>, i32 -> vector<4x256xf32>
    %cst = arith.constant 0.000000e+00 : f32
    %33 = vector.shape_cast %25 : vector<1x256xi1> to vector<1x256xi1>
    %34 = vector.broadcast %33 : vector<1x256xi1> to vector<4x256xi1>
    %35 = vector.broadcast %cst : f32 to vector<4x256xf32>
    %36 = arith.select %34, %32, %35 : vector<4x256xi1>, vector<4x256xf32>
    %c0_9 = arith.constant 0 : index
    %c0_10 = arith.constant 0 : index
    %c0_11 = arith.constant 0 : index
    %37 = vector.load %arg2[%c0_9, %c0_10, %c0_11] : memref<9x4x4xf32, #tpu.memory_space<vmem>>, vector<1x4x4xf32>
    %38 = vector.shape_cast %37 : vector<1x4x4xf32> to vector<4x4xf32>
    %cst_12 = arith.constant dense<0.000000e+00> : vector<4x256xf32>
    %39 = tpu.matmul %38, %36, %cst_12 {dimension_numbers = #tpu.dot_dimension_numbers<[1], [0], [0], [1], [0, 0, 1, 1], [], []>} : vector<4x4xf32>, vector<4x256xf32>, vector<4x256xf32> -> vector<4x256xf32>
    %cst_13 = arith.constant 0.000000e+00 : f32
    %40 = vector.shape_cast %18 : vector<1x256xi1> to vector<1x256xi1>
    %41 = vector.broadcast %40 : vector<1x256xi1> to vector<4x256xi1>
    %42 = vector.broadcast %cst_13 : f32 to vector<4x256xf32>
    %43 = arith.select %41, %31, %42 : vector<4x256xi1>, vector<4x256xf32>
    %c1 = arith.constant 1 : index
    %c0_14 = arith.constant 0 : index
    %c0_15 = arith.constant 0 : index
    %44 = vector.load %arg2[%c1, %c0_14, %c0_15] : memref<9x4x4xf32, #tpu.memory_space<vmem>>, vector<1x4x4xf32>
    %45 = vector.shape_cast %44 : vector<1x4x4xf32> to vector<4x4xf32>
    %cst_16 = arith.constant dense<0.000000e+00> : vector<4x256xf32>
    %46 = tpu.matmul %45, %43, %cst_16 {dimension_numbers = #tpu.dot_dimension_numbers<[1], [0], [0], [1], [0, 0, 1, 1], [], []>} : vector<4x4xf32>, vector<4x256xf32>, vector<4x256xf32> -> vector<4x256xf32>
    %47 = arith.addf %39, %46 : vector<4x256xf32>
    %c255_i32 = arith.constant 255 : i32
    %48 = tpu.dynamic_rotate %31 by %c255_i32 dim 1 : vector<4x256xf32>, i32 -> vector<4x256xf32>
    %cst_17 = arith.constant 0.000000e+00 : f32
    %49 = vector.shape_cast %26 : vector<1x256xi1> to vector<1x256xi1>
    %50 = vector.broadcast %49 : vector<1x256xi1> to vector<4x256xi1>
    %51 = vector.broadcast %cst_17 : f32 to vector<4x256xf32>
    %52 = arith.select %50, %48, %51 : vector<4x256xi1>, vector<4x256xf32>
    %c2 = arith.constant 2 : index
    %c0_18 = arith.constant 0 : index
    %c0_19 = arith.constant 0 : index
    %53 = vector.load %arg2[%c2, %c0_18, %c0_19] : memref<9x4x4xf32, #tpu.memory_space<vmem>>, vector<1x4x4xf32>
    %54 = vector.shape_cast %53 : vector<1x4x4xf32> to vector<4x4xf32>
    %cst_20 = arith.constant dense<0.000000e+00> : vector<4x256xf32>
    %55 = tpu.matmul %54, %52, %cst_20 {dimension_numbers = #tpu.dot_dimension_numbers<[1], [0], [0], [1], [0, 0, 1, 1], [], []>} : vector<4x4xf32>, vector<4x256xf32>, vector<4x256xf32> -> vector<4x256xf32>
    %56 = arith.addf %47, %55 : vector<4x256xf32>
    %c1_i32_21 = arith.constant 1 : i32
    %57 = tpu.dynamic_rotate %30 by %c1_i32_21 dim 1 : vector<4x256xf32>, i32 -> vector<4x256xf32>
    %cst_22 = arith.constant 0.000000e+00 : f32
    %58 = vector.shape_cast %22 : vector<1x256xi1> to vector<1x256xi1>
    %59 = vector.broadcast %58 : vector<1x256xi1> to vector<4x256xi1>
    %60 = vector.broadcast %cst_22 : f32 to vector<4x256xf32>
    %61 = arith.select %59, %57, %60 : vector<4x256xi1>, vector<4x256xf32>
    %c3 = arith.constant 3 : index
    %c0_23 = arith.constant 0 : index
    %c0_24 = arith.constant 0 : index
    %62 = vector.load %arg2[%c3, %c0_23, %c0_24] : memref<9x4x4xf32, #tpu.memory_space<vmem>>, vector<1x4x4xf32>
    %63 = vector.shape_cast %62 : vector<1x4x4xf32> to vector<4x4xf32>
    %cst_25 = arith.constant dense<0.000000e+00> : vector<4x256xf32>
    %64 = tpu.matmul %63, %61, %cst_25 {dimension_numbers = #tpu.dot_dimension_numbers<[1], [0], [0], [1], [0, 0, 1, 1], [], []>} : vector<4x4xf32>, vector<4x256xf32>, vector<4x256xf32> -> vector<4x256xf32>
    %65 = arith.addf %56, %64 : vector<4x256xf32>
    %c4 = arith.constant 4 : index
    %c0_26 = arith.constant 0 : index
    %c0_27 = arith.constant 0 : index
    %66 = vector.load %arg2[%c4, %c0_26, %c0_27] : memref<9x4x4xf32, #tpu.memory_space<vmem>>, vector<1x4x4xf32>
    %67 = vector.shape_cast %66 : vector<1x4x4xf32> to vector<4x4xf32>
    %cst_28 = arith.constant dense<0.000000e+00> : vector<4x256xf32>
    %68 = tpu.matmul %67, %30, %cst_28 {dimension_numbers = #tpu.dot_dimension_numbers<[1], [0], [0], [1], [0, 0, 1, 1], [], []>} : vector<4x4xf32>, vector<4x256xf32>, vector<4x256xf32> -> vector<4x256xf32>
    %69 = arith.addf %65, %68 : vector<4x256xf32>
    %c255_i32_29 = arith.constant 255 : i32
    %70 = tpu.dynamic_rotate %30 by %c255_i32_29 dim 1 : vector<4x256xf32>, i32 -> vector<4x256xf32>
    %cst_30 = arith.constant 0.000000e+00 : f32
    %71 = vector.shape_cast %24 : vector<1x256xi1> to vector<1x256xi1>
    %72 = vector.broadcast %71 : vector<1x256xi1> to vector<4x256xi1>
    %73 = vector.broadcast %cst_30 : f32 to vector<4x256xf32>
    %74 = arith.select %72, %70, %73 : vector<4x256xi1>, vector<4x256xf32>
    %c5 = arith.constant 5 : index
    %c0_31 = arith.constant 0 : index
    %c0_32 = arith.constant 0 : index
    %75 = vector.load %arg2[%c5, %c0_31, %c0_32] : memref<9x4x4xf32, #tpu.memory_space<vmem>>, vector<1x4x4xf32>
    %76 = vector.shape_cast %75 : vector<1x4x4xf32> to vector<4x4xf32>
    %cst_33 = arith.constant dense<0.000000e+00> : vector<4x256xf32>
    %77 = tpu.matmul %76, %74, %cst_33 {dimension_numbers = #tpu.dot_dimension_numbers<[1], [0], [0], [1], [0, 0, 1, 1], [], []>} : vector<4x4xf32>, vector<4x256xf32>, vector<4x256xf32> -> vector<4x256xf32>
    %78 = arith.addf %69, %77 : vector<4x256xf32>
    %c240_i32_34 = arith.constant 240 : i32
    %79 = tpu.dynamic_rotate %30 by %c240_i32_34 dim 1 : vector<4x256xf32>, i32 -> vector<4x256xf32>
    %c1_i32_35 = arith.constant 1 : i32
    %80 = tpu.dynamic_rotate %79 by %c1_i32_35 dim 1 : vector<4x256xf32>, i32 -> vector<4x256xf32>
    %cst_36 = arith.constant 0.000000e+00 : f32
    %81 = vector.shape_cast %27 : vector<1x256xi1> to vector<1x256xi1>
    %82 = vector.broadcast %81 : vector<1x256xi1> to vector<4x256xi1>
    %83 = vector.broadcast %cst_36 : f32 to vector<4x256xf32>
    %84 = arith.select %82, %80, %83 : vector<4x256xi1>, vector<4x256xf32>
    %c6 = arith.constant 6 : index
    %c0_37 = arith.constant 0 : index
    %c0_38 = arith.constant 0 : index
    %85 = vector.load %arg2[%c6, %c0_37, %c0_38] : memref<9x4x4xf32, #tpu.memory_space<vmem>>, vector<1x4x4xf32>
    %86 = vector.shape_cast %85 : vector<1x4x4xf32> to vector<4x4xf32>
    %cst_39 = arith.constant dense<0.000000e+00> : vector<4x256xf32>
    %87 = tpu.matmul %86, %84, %cst_39 {dimension_numbers = #tpu.dot_dimension_numbers<[1], [0], [0], [1], [0, 0, 1, 1], [], []>} : vector<4x4xf32>, vector<4x256xf32>, vector<4x256xf32> -> vector<4x256xf32>
    %88 = arith.addf %78, %87 : vector<4x256xf32>
    %cst_40 = arith.constant 0.000000e+00 : f32
    %89 = vector.shape_cast %20 : vector<1x256xi1> to vector<1x256xi1>
    %90 = vector.broadcast %89 : vector<1x256xi1> to vector<4x256xi1>
    %91 = vector.broadcast %cst_40 : f32 to vector<4x256xf32>
    %92 = arith.select %90, %79, %91 : vector<4x256xi1>, vector<4x256xf32>
    %c7 = arith.constant 7 : index
    %c0_41 = arith.constant 0 : index
    %c0_42 = arith.constant 0 : index
    %93 = vector.load %arg2[%c7, %c0_41, %c0_42] : memref<9x4x4xf32, #tpu.memory_space<vmem>>, vector<1x4x4xf32>
    %94 = vector.shape_cast %93 : vector<1x4x4xf32> to vector<4x4xf32>
    %cst_43 = arith.constant dense<0.000000e+00> : vector<4x256xf32>
    %95 = tpu.matmul %94, %92, %cst_43 {dimension_numbers = #tpu.dot_dimension_numbers<[1], [0], [0], [1], [0, 0, 1, 1], [], []>} : vector<4x4xf32>, vector<4x256xf32>, vector<4x256xf32> -> vector<4x256xf32>
    %96 = arith.addf %88, %95 : vector<4x256xf32>
    %c255_i32_44 = arith.constant 255 : i32
    %97 = tpu.dynamic_rotate %79 by %c255_i32_44 dim 1 : vector<4x256xf32>, i32 -> vector<4x256xf32>
    %cst_45 = arith.constant 0.000000e+00 : f32
    %98 = vector.shape_cast %28 : vector<1x256xi1> to vector<1x256xi1>
    %99 = vector.broadcast %98 : vector<1x256xi1> to vector<4x256xi1>
    %100 = vector.broadcast %cst_45 : f32 to vector<4x256xf32>
    %101 = arith.select %99, %97, %100 : vector<4x256xi1>, vector<4x256xf32>
    %c8 = arith.constant 8 : index
    %c0_46 = arith.constant 0 : index
    %c0_47 = arith.constant 0 : index
    %102 = vector.load %arg2[%c8, %c0_46, %c0_47] : memref<9x4x4xf32, #tpu.memory_space<vmem>>, vector<1x4x4xf32>
    %103 = vector.shape_cast %102 : vector<1x4x4xf32> to vector<4x4xf32>
    %cst_48 = arith.constant dense<0.000000e+00> : vector<4x256xf32>
    %104 = tpu.matmul %103, %101, %cst_48 {dimension_numbers = #tpu.dot_dimension_numbers<[1], [0], [0], [1], [0, 0, 1, 1], [], []>} : vector<4x4xf32>, vector<4x256xf32>, vector<4x256xf32> -> vector<4x256xf32>
    %105 = arith.addf %96, %104 : vector<4x256xf32>
    %cst_49 = arith.constant dense<0.000000e+00> : vector<4xf32>
    %106 = vector.multi_reduction <add>, %105, %cst_49 [1] : vector<4x256xf32> to vector<4xf32>
    %107 = vector.shape_cast %106 : vector<4xf32> to vector<4x1xf32>
    %cst_50 = arith.constant 3.906250e-03 : f32
    %108 = vector.broadcast %cst_50 : f32 to vector<4x1xf32>
    %109 = arith.mulf %107, %108 : vector<4x1xf32>
    %110 = arith.mulf %105, %105 : vector<4x256xf32>
    %cst_51 = arith.constant dense<0.000000e+00> : vector<4xf32>
    %111 = vector.multi_reduction <add>, %110, %cst_51 [1] : vector<4x256xf32> to vector<4xf32>
    %112 = vector.shape_cast %111 : vector<4xf32> to vector<4x1xf32>
    %cst_52 = arith.constant 3.906250e-03 : f32
    %113 = vector.broadcast %cst_52 : f32 to vector<4x1xf32>
    %114 = arith.mulf %112, %113 : vector<4x1xf32>
    %115 = arith.mulf %109, %109 : vector<4x1xf32>
    %116 = arith.subf %114, %115 : vector<4x1xf32>
    %117 = vector.broadcast %109 : vector<4x1xf32> to vector<4x256xf32>
    %118 = arith.subf %105, %117 : vector<4x256xf32>
    %cst_53 = arith.constant 9.99999974E-6 : f32
    %119 = vector.broadcast %cst_53 : f32 to vector<4x1xf32>
    %120 = arith.addf %116, %119 : vector<4x1xf32>
    %121 = math.rsqrt %120 : vector<4x1xf32>
    %122 = vector.broadcast %121 : vector<4x1xf32> to vector<4x256xf32>
    %123 = arith.mulf %118, %122 : vector<4x256xf32>
    %cst_54 = arith.constant 0.000000e+00 : f32
    %124 = vector.broadcast %cst_54 : f32 to vector<4x256xf32>
    %125 = arith.maximumf %123, %124 : vector<4x256xf32>
    %c16_i32_55 = arith.constant 16 : i32
    %126 = tpu.dynamic_rotate %125 by %c16_i32_55 dim 1 : vector<4x256xf32>, i32 -> vector<4x256xf32>
    %c1_i32_56 = arith.constant 1 : i32
    %127 = tpu.dynamic_rotate %126 by %c1_i32_56 dim 1 : vector<4x256xf32>, i32 -> vector<4x256xf32>
    %cst_57 = arith.constant 0.000000e+00 : f32
    %128 = vector.shape_cast %25 : vector<1x256xi1> to vector<1x256xi1>
    %129 = vector.broadcast %128 : vector<1x256xi1> to vector<4x256xi1>
    %130 = vector.broadcast %cst_57 : f32 to vector<4x256xf32>
    %131 = arith.select %129, %127, %130 : vector<4x256xi1>, vector<4x256xf32>
    %c0_58 = arith.constant 0 : index
    %c0_59 = arith.constant 0 : index
    %c0_60 = arith.constant 0 : index
    %132 = vector.load %arg3[%c0_58, %c0_59, %c0_60] : memref<9x4x4xf32, #tpu.memory_space<vmem>>, vector<1x4x4xf32>
    %133 = vector.shape_cast %132 : vector<1x4x4xf32> to vector<4x4xf32>
    %cst_61 = arith.constant dense<0.000000e+00> : vector<4x256xf32>
    %134 = tpu.matmul %133, %131, %cst_61 {dimension_numbers = #tpu.dot_dimension_numbers<[1], [0], [0], [1], [0, 0, 1, 1], [], []>} : vector<4x4xf32>, vector<4x256xf32>, vector<4x256xf32> -> vector<4x256xf32>
    %cst_62 = arith.constant 0.000000e+00 : f32
    %135 = vector.shape_cast %18 : vector<1x256xi1> to vector<1x256xi1>
    %136 = vector.broadcast %135 : vector<1x256xi1> to vector<4x256xi1>
    %137 = vector.broadcast %cst_62 : f32 to vector<4x256xf32>
    %138 = arith.select %136, %126, %137 : vector<4x256xi1>, vector<4x256xf32>
    %c1_63 = arith.constant 1 : index
    %c0_64 = arith.constant 0 : index
    %c0_65 = arith.constant 0 : index
    %139 = vector.load %arg3[%c1_63, %c0_64, %c0_65] : memref<9x4x4xf32, #tpu.memory_space<vmem>>, vector<1x4x4xf32>
    %140 = vector.shape_cast %139 : vector<1x4x4xf32> to vector<4x4xf32>
    %cst_66 = arith.constant dense<0.000000e+00> : vector<4x256xf32>
    %141 = tpu.matmul %140, %138, %cst_66 {dimension_numbers = #tpu.dot_dimension_numbers<[1], [0], [0], [1], [0, 0, 1, 1], [], []>} : vector<4x4xf32>, vector<4x256xf32>, vector<4x256xf32> -> vector<4x256xf32>
    %142 = arith.addf %134, %141 : vector<4x256xf32>
    %c255_i32_67 = arith.constant 255 : i32
    %143 = tpu.dynamic_rotate %126 by %c255_i32_67 dim 1 : vector<4x256xf32>, i32 -> vector<4x256xf32>
    %cst_68 = arith.constant 0.000000e+00 : f32
    %144 = vector.shape_cast %26 : vector<1x256xi1> to vector<1x256xi1>
    %145 = vector.broadcast %144 : vector<1x256xi1> to vector<4x256xi1>
    %146 = vector.broadcast %cst_68 : f32 to vector<4x256xf32>
    %147 = arith.select %145, %143, %146 : vector<4x256xi1>, vector<4x256xf32>
    %c2_69 = arith.constant 2 : index
    %c0_70 = arith.constant 0 : index
    %c0_71 = arith.constant 0 : index
    %148 = vector.load %arg3[%c2_69, %c0_70, %c0_71] : memref<9x4x4xf32, #tpu.memory_space<vmem>>, vector<1x4x4xf32>
    %149 = vector.shape_cast %148 : vector<1x4x4xf32> to vector<4x4xf32>
    %cst_72 = arith.constant dense<0.000000e+00> : vector<4x256xf32>
    %150 = tpu.matmul %149, %147, %cst_72 {dimension_numbers = #tpu.dot_dimension_numbers<[1], [0], [0], [1], [0, 0, 1, 1], [], []>} : vector<4x4xf32>, vector<4x256xf32>, vector<4x256xf32> -> vector<4x256xf32>
    %151 = arith.addf %142, %150 : vector<4x256xf32>
    %c1_i32_73 = arith.constant 1 : i32
    %152 = tpu.dynamic_rotate %125 by %c1_i32_73 dim 1 : vector<4x256xf32>, i32 -> vector<4x256xf32>
    %cst_74 = arith.constant 0.000000e+00 : f32
    %153 = vector.shape_cast %22 : vector<1x256xi1> to vector<1x256xi1>
    %154 = vector.broadcast %153 : vector<1x256xi1> to vector<4x256xi1>
    %155 = vector.broadcast %cst_74 : f32 to vector<4x256xf32>
    %156 = arith.select %154, %152, %155 : vector<4x256xi1>, vector<4x256xf32>
    %c3_75 = arith.constant 3 : index
    %c0_76 = arith.constant 0 : index
    %c0_77 = arith.constant 0 : index
    %157 = vector.load %arg3[%c3_75, %c0_76, %c0_77] : memref<9x4x4xf32, #tpu.memory_space<vmem>>, vector<1x4x4xf32>
    %158 = vector.shape_cast %157 : vector<1x4x4xf32> to vector<4x4xf32>
    %cst_78 = arith.constant dense<0.000000e+00> : vector<4x256xf32>
    %159 = tpu.matmul %158, %156, %cst_78 {dimension_numbers = #tpu.dot_dimension_numbers<[1], [0], [0], [1], [0, 0, 1, 1], [], []>} : vector<4x4xf32>, vector<4x256xf32>, vector<4x256xf32> -> vector<4x256xf32>
    %160 = arith.addf %151, %159 : vector<4x256xf32>
    %c4_79 = arith.constant 4 : index
    %c0_80 = arith.constant 0 : index
    %c0_81 = arith.constant 0 : index
    %161 = vector.load %arg3[%c4_79, %c0_80, %c0_81] : memref<9x4x4xf32, #tpu.memory_space<vmem>>, vector<1x4x4xf32>
    %162 = vector.shape_cast %161 : vector<1x4x4xf32> to vector<4x4xf32>
    %cst_82 = arith.constant dense<0.000000e+00> : vector<4x256xf32>
    %163 = tpu.matmul %162, %125, %cst_82 {dimension_numbers = #tpu.dot_dimension_numbers<[1], [0], [0], [1], [0, 0, 1, 1], [], []>} : vector<4x4xf32>, vector<4x256xf32>, vector<4x256xf32> -> vector<4x256xf32>
    %164 = arith.addf %160, %163 : vector<4x256xf32>
    %c255_i32_83 = arith.constant 255 : i32
    %165 = tpu.dynamic_rotate %125 by %c255_i32_83 dim 1 : vector<4x256xf32>, i32 -> vector<4x256xf32>
    %cst_84 = arith.constant 0.000000e+00 : f32
    %166 = vector.shape_cast %24 : vector<1x256xi1> to vector<1x256xi1>
    %167 = vector.broadcast %166 : vector<1x256xi1> to vector<4x256xi1>
    %168 = vector.broadcast %cst_84 : f32 to vector<4x256xf32>
    %169 = arith.select %167, %165, %168 : vector<4x256xi1>, vector<4x256xf32>
    %c5_85 = arith.constant 5 : index
    %c0_86 = arith.constant 0 : index
    %c0_87 = arith.constant 0 : index
    %170 = vector.load %arg3[%c5_85, %c0_86, %c0_87] : memref<9x4x4xf32, #tpu.memory_space<vmem>>, vector<1x4x4xf32>
    %171 = vector.shape_cast %170 : vector<1x4x4xf32> to vector<4x4xf32>
    %cst_88 = arith.constant dense<0.000000e+00> : vector<4x256xf32>
    %172 = tpu.matmul %171, %169, %cst_88 {dimension_numbers = #tpu.dot_dimension_numbers<[1], [0], [0], [1], [0, 0, 1, 1], [], []>} : vector<4x4xf32>, vector<4x256xf32>, vector<4x256xf32> -> vector<4x256xf32>
    %173 = arith.addf %164, %172 : vector<4x256xf32>
    %c240_i32_89 = arith.constant 240 : i32
    %174 = tpu.dynamic_rotate %125 by %c240_i32_89 dim 1 : vector<4x256xf32>, i32 -> vector<4x256xf32>
    %c1_i32_90 = arith.constant 1 : i32
    %175 = tpu.dynamic_rotate %174 by %c1_i32_90 dim 1 : vector<4x256xf32>, i32 -> vector<4x256xf32>
    %cst_91 = arith.constant 0.000000e+00 : f32
    %176 = vector.shape_cast %27 : vector<1x256xi1> to vector<1x256xi1>
    %177 = vector.broadcast %176 : vector<1x256xi1> to vector<4x256xi1>
    %178 = vector.broadcast %cst_91 : f32 to vector<4x256xf32>
    %179 = arith.select %177, %175, %178 : vector<4x256xi1>, vector<4x256xf32>
    %c6_92 = arith.constant 6 : index
    %c0_93 = arith.constant 0 : index
    %c0_94 = arith.constant 0 : index
    %180 = vector.load %arg3[%c6_92, %c0_93, %c0_94] : memref<9x4x4xf32, #tpu.memory_space<vmem>>, vector<1x4x4xf32>
    %181 = vector.shape_cast %180 : vector<1x4x4xf32> to vector<4x4xf32>
    %cst_95 = arith.constant dense<0.000000e+00> : vector<4x256xf32>
    %182 = tpu.matmul %181, %179, %cst_95 {dimension_numbers = #tpu.dot_dimension_numbers<[1], [0], [0], [1], [0, 0, 1, 1], [], []>} : vector<4x4xf32>, vector<4x256xf32>, vector<4x256xf32> -> vector<4x256xf32>
    %183 = arith.addf %173, %182 : vector<4x256xf32>
    %cst_96 = arith.constant 0.000000e+00 : f32
    %184 = vector.shape_cast %20 : vector<1x256xi1> to vector<1x256xi1>
    %185 = vector.broadcast %184 : vector<1x256xi1> to vector<4x256xi1>
    %186 = vector.broadcast %cst_96 : f32 to vector<4x256xf32>
    %187 = arith.select %185, %174, %186 : vector<4x256xi1>, vector<4x256xf32>
    %c7_97 = arith.constant 7 : index
    %c0_98 = arith.constant 0 : index
    %c0_99 = arith.constant 0 : index
    %188 = vector.load %arg3[%c7_97, %c0_98, %c0_99] : memref<9x4x4xf32, #tpu.memory_space<vmem>>, vector<1x4x4xf32>
    %189 = vector.shape_cast %188 : vector<1x4x4xf32> to vector<4x4xf32>
    %cst_100 = arith.constant dense<0.000000e+00> : vector<4x256xf32>
    %190 = tpu.matmul %189, %187, %cst_100 {dimension_numbers = #tpu.dot_dimension_numbers<[1], [0], [0], [1], [0, 0, 1, 1], [], []>} : vector<4x4xf32>, vector<4x256xf32>, vector<4x256xf32> -> vector<4x256xf32>
    %191 = arith.addf %183, %190 : vector<4x256xf32>
    %c255_i32_101 = arith.constant 255 : i32
    %192 = tpu.dynamic_rotate %174 by %c255_i32_101 dim 1 : vector<4x256xf32>, i32 -> vector<4x256xf32>
    %cst_102 = arith.constant 0.000000e+00 : f32
    %193 = vector.shape_cast %28 : vector<1x256xi1> to vector<1x256xi1>
    %194 = vector.broadcast %193 : vector<1x256xi1> to vector<4x256xi1>
    %195 = vector.broadcast %cst_102 : f32 to vector<4x256xf32>
    %196 = arith.select %194, %192, %195 : vector<4x256xi1>, vector<4x256xf32>
    %c8_103 = arith.constant 8 : index
    %c0_104 = arith.constant 0 : index
    %c0_105 = arith.constant 0 : index
    %197 = vector.load %arg3[%c8_103, %c0_104, %c0_105] : memref<9x4x4xf32, #tpu.memory_space<vmem>>, vector<1x4x4xf32>
    %198 = vector.shape_cast %197 : vector<1x4x4xf32> to vector<4x4xf32>
    %cst_106 = arith.constant dense<0.000000e+00> : vector<4x256xf32>
    %199 = tpu.matmul %198, %196, %cst_106 {dimension_numbers = #tpu.dot_dimension_numbers<[1], [0], [0], [1], [0, 0, 1, 1], [], []>} : vector<4x4xf32>, vector<4x256xf32>, vector<4x256xf32> -> vector<4x256xf32>
    %200 = arith.addf %191, %199 : vector<4x256xf32>
    %cst_107 = arith.constant dense<0.000000e+00> : vector<4xf32>
    %201 = vector.multi_reduction <add>, %200, %cst_107 [1] : vector<4x256xf32> to vector<4xf32>
    %202 = vector.shape_cast %201 : vector<4xf32> to vector<4x1xf32>
    %cst_108 = arith.constant 3.906250e-03 : f32
    %203 = vector.broadcast %cst_108 : f32 to vector<4x1xf32>
    %204 = arith.mulf %202, %203 : vector<4x1xf32>
    %205 = arith.mulf %200, %200 : vector<4x256xf32>
    %cst_109 = arith.constant dense<0.000000e+00> : vector<4xf32>
    %206 = vector.multi_reduction <add>, %205, %cst_109 [1] : vector<4x256xf32> to vector<4xf32>
    %207 = vector.shape_cast %206 : vector<4xf32> to vector<4x1xf32>
    %cst_110 = arith.constant 3.906250e-03 : f32
    %208 = vector.broadcast %cst_110 : f32 to vector<4x1xf32>
    %209 = arith.mulf %207, %208 : vector<4x1xf32>
    %210 = arith.mulf %204, %204 : vector<4x1xf32>
    %211 = arith.subf %209, %210 : vector<4x1xf32>
    %212 = vector.broadcast %204 : vector<4x1xf32> to vector<4x256xf32>
    %213 = arith.subf %200, %212 : vector<4x256xf32>
    %cst_111 = arith.constant 9.99999974E-6 : f32
    %214 = vector.broadcast %cst_111 : f32 to vector<4x1xf32>
    %215 = arith.addf %211, %214 : vector<4x1xf32>
    %216 = math.rsqrt %215 : vector<4x1xf32>
    %217 = vector.broadcast %216 : vector<4x1xf32> to vector<4x256xf32>
    %218 = arith.mulf %213, %217 : vector<4x256xf32>
    %c0_112 = arith.constant 0 : index
    %c0_113 = arith.constant 0 : index
    %c0_114 = arith.constant 0 : index
    %219 = vector.load %arg1[%c0_112, %c0_113, %c0_114] : memref<1x4x256xf32, #tpu.memory_space<vmem>>, vector<1x4x256xf32>
    %220 = vector.shape_cast %219 : vector<1x4x256xf32> to vector<4x256xf32>
    %221 = arith.addf %220, %218 : vector<4x256xf32>
    %c0_115 = arith.constant 0 : index
    %c0_116 = arith.constant 0 : index
    %c0_117 = arith.constant 0 : index
    %222 = vector.load %arg4[%c0_115, %c0_116, %c0_117] : memref<1x4x256xf32, #tpu.memory_space<vmem>>, vector<1x4x256xf32>
    %223 = vector.shape_cast %222 : vector<1x4x256xf32> to vector<4x256xf32>
    %224 = vector.shape_cast %221 : vector<4x256xf32> to vector<1x4x256xf32>
    tpu.vector_store %arg4[%c0_115, %c0_116, %c0_117], %224 {strides = array<i32>} : memref<1x4x256xf32, #tpu.memory_space<vmem>>, vector<1x4x256xf32>,
    return
  }
  func.func @transform_0(%arg0: i32) -> (i32, i32, i32) {
    %c0_i32 = arith.constant 0 : i32
    %c0_i32_0 = arith.constant 0 : i32
    %c0_i32_1 = arith.constant 0 : i32
    return %arg0, %c0_i32, %c0_i32_0 : i32, i32, i32
  }
  func.func @transform_1(%arg0: i32) -> (i32, i32, i32) {
    %c0_i32 = arith.constant 0 : i32
    %c0_i32_0 = arith.constant 0 : i32
    %c0_i32_1 = arith.constant 0 : i32
    %c0_i32_2 = arith.constant 0 : i32
    return %c0_i32, %c0_i32_0, %c0_i32_1 : i32, i32, i32
  }
  func.func @transform_2(%arg0: i32) -> (i32, i32, i32) {
    %c0_i32 = arith.constant 0 : i32
    %c0_i32_0 = arith.constant 0 : i32
    %c0_i32_1 = arith.constant 0 : i32
    %c0_i32_2 = arith.constant 0 : i32
    return %c0_i32, %c0_i32_0, %c0_i32_1 : i32, i32, i32
  }
  func.func @transform_3(%arg0: i32) -> (i32, i32, i32) {
    %c0_i32 = arith.constant 0 : i32
    %c0_i32_0 = arith.constant 0 : i32
    %c0_i32_1 = arith.constant 0 : i32
    return %arg0, %c0_i32, %c0_i32_0 : i32, i32, i32
  }
}

</mosaic_0001>

<bundles_post_ra>
// kernel: tpu_custom_call.1
= control target key start
LH: loop header
LB: loop body
LE: loop exit
PB: predicated region body
PF: predicated region fallthrough
CT: control target
= control target key end

     0   :  { %8 = vsyncpa [#allocation3], 0  ;;  %s2704_s0 = inlined_call_operand.vmem [shape: f32[2,4,256], index: 0, kind: input, shape index: {}]   ;;  %s2705_s1 = inlined_call_operand.vmem [shape: f32[9,4,4], index: 1, kind: input, shape index: {}]   ;;  %s2706_s2 = inlined_call_operand.vmem [shape: f32[9,4,4], index: 2, kind: input, shape index: {}]   ;;  %s2707_s3 = inlined_call_operand.hbm [shape: f32[2,4,256], index: 3, kind: output, shape index: {}]  }
   0x1   :  { %10 = vsyncpa [#allocation3 + $0x1], 0  ;;  %s2229_s12 = smov 0   ;;  %s2231_s13 = smov 0  }
   0x2   :  { %s2233_s14 = smov 0   ;;  %s2235_s15 = smov 0  }
   0x3 LB: > { %s2250_s16 = sadd.s32 4294967295, %s2201_s15   ;;  %s2008_s17 = sadd.s32 4294967294, %s2201_s15   ;;  %s2201_s15 = sphi %s2235_s15, %s2729_s15   ;;  %s2197_s14 = sphi %s2233_s14, %s2728_s14   ;;  %s2193_s13 = sphi %s2231_s13, %s2727_s13   ;;  %s2189_s12 = sphi %s2229_s12, %s2726_s12  }
   0x4   : > { %s2254_s18 = sadd.s32 1, %s2201_s15   ;;  %s91_s19 = sadd.s32 1, %s2197_s14 }
   0x5   : > { %s88_s20 = ssub.s32 %s2201_s15, %s2254_s18  ;;  %p101_p0 = scmp.ne.s32.totalorder %s2197_s14, %s2193_s13 }
   0x6   : > { %p89_p1 = scmp.eq.s32.totalorder %s88_s20, 0  ;;  %p102_p2 = scmp.eq.s32.totalorder %s2250_s16, 1 }
   0x7   : > { %p107_p3 = scmp.ne.s32.totalorder %s2193_s13, %s2189_s12  ;;  %p108_p4 = scmp.eq.s32.totalorder %s2008_s17, 1 }
   0x8   : > { %s2265_s21 = scalar_select %p89_p1, %s2197_s14, %s91_s19  }
   0x9   : > { %p2267_p5 = por %p102_p2, %p101_p0  ;;  %p2271_p6 = por %p108_p4, %p107_p3 }
   0xa   : > { %p2011_p7 = scmp.ge.s32.totalorder %s2201_s15, 1  ;;  %p140_p8 = scmp.lt.s32.totalorder %s2201_s15, 3 }
   0xc   : > { %p141_p9 = pnand %p2011_p7, %p140_p8 }
   0xd   : > { %p164_p10 = scmp.lt.s32.totalorder (!%p141_p9), %s2250_s16, 1  ;;  %s2203_s29 = smov (!%p141_p9), 16  }
   0xe   : > { %144 = sbr.rel (%p141_p9) target bundleno = 1273 (0x4f9), region = 32  ;;  %s2204_s30 = smov (!%p141_p9), 112  }
   0xf   : > { %s2205_s4 = smov (!%p141_p9), 1   ;;  %s2207_s7 = smov (!%p141_p9), 127  }
  0x13   : > { %s165_s24 = scalar_select %p164_p10, %s2250_s16, 1  ;;  %v169_v2 = vlaneseq  ;;  %v2206_v3 = vmov 0.0   ;;  %vm249_vm2 = vcmask 1043456   ;;  %v2015_v10 = vld [vmem:[%s2705_s1 + $0x4] sm:$0xf]  ;;  %vm245_vm3 = vcmask 31744  }
  0x14   : > { %320 = vmatprep.mubr.f32.mxu0 %v2206_v3  ;;  %400 = vmatprep.mubr.f32.mxu1 %v2206_v3  ;;  %v236_v32 = vld [vmem:[%s2705_s1] sm:$0xf]  ;;  %v2022_v43 = vld [vmem:[%s2705_s1 + $0x8] sm:$0xf]  ;;  %v2026_v44 = vld [vmem:[%s2705_s1 + $0xc] sm:$0xf] }
  0x15   : > { %s2090_s25 = sshll.u32 %s165_s24, 3  ;;  %v2302_v4 = vand.u32 127, %v169_v2  ;;  %v2030_v51 = vld [vmem:[%s2705_s1 + $0x10] sm:$0xf]  ;;  %v2034_v52 = vld [vmem:[%s2705_s1 + $0x14] sm:$0xf] }
  0x16   : > { %s168_s28 = scalar_lea.vmem %s2704_s0, %s2090_s25  ;;  %v2038_v61 = vld [vmem:[%s2705_s1 + $0x18] sm:$0xf]  ;;  %v2042_v62 = vld [vmem:[%s2705_s1 + $0x1c] sm:$0xf]  ;;  %s2208_s25 = smov [#allocation2]  }
  0x17   : > { %v2282_v0 = vld [vmem:[%s168_s28] sm:$0xff]  ;;  %vm220_vm0 = vcmp.lt.s32.totalorder %v2302_v4, 16  ;;  %vm196_vm1 = vcmp.ge.s32.totalorder %v2302_v4, 16  ;;  %vm782_vm4 = vcmp.lt.s32.totalorder %v2302_v4, 112  ;;  %v176_v16 = vand.u32 15, %v2302_v4  ;;  %s2145_s26 = sshll.u32 %s2208_s25, 4  ;;  %s2146_s26 = int_to_ptr.vmem [resolvable:$false] %s2145_s26 }
  0x18   : > { %216 = vrot.lane.b32.xlu0 %v2282_v0, %s2203_s29  ;;  %v2288_v1 = vcombine.high %v2282_v0, %v2282_v0  ;;  %778 = vrot.lane.b32.xlu1 %v2282_v0, %s2204_s30  ;;  %v2346_v18 = vadd.s32 128, %v2302_v4  ;;  %vm227_vm6 = vcmp.lt.s32.totalorder %v2302_v4, 1  ;;  %vm411_vm10 = vcmp.lt.s32.totalorder %v2302_v4, 127  ;;  %v2077_v20 = vld [vmem:[%s2706_s2 + $0x1c] sm:$0xf] }
  0x19   : > { %vm2349_vm5 = vcmp.ne.s32.totalorder %v176_v16, 0  ;;  %vm2362_vm8 = vcmp.ne.s32.totalorder %v176_v16, 15 }
  0x1a   : > { %v183_v19 = vand.u32 15, %v2346_v18  ;;  %vm2358_vm7 = vmand %vm196_vm1, %vm2349_vm5  ;;  %vm199_vm13 = vcmp.lt.s32.totalorder %v2346_v18, 240  ;;  %v2073_v18 = vld [vmem:[%s2706_s2 + $0x18] sm:$0xf] }
  0x1b   : > { %vm2395_vm12 = vmand %vm196_vm1, %vm2362_vm8 }
  0x1c   : > { %218 = vrot.lane.b32.xlu0 %v2288_v1, %s2203_s29  ;;  %780 = vrot.lane.b32.xlu1 %v2288_v1, %s2204_s30  ;;  %vm2366_vm9 = vcmp.ne.s32.totalorder %v183_v19, 0  ;;  %vm2387_vm11 = vcmp.ne.s32.totalorder %v183_v19, 15 }
  0x1d   : > { %vm2451_vm14 = vmand %vm199_vm13, %vm2366_vm9 }
  0x1e   : > { %vm2485_vm15 = vmand %vm199_vm13, %vm2387_vm11 }
  0x20   : > { %506 = vrot.lane.b32.xlu1 %v2288_v1, %s2205_s4  ;;  %504 = vrot.lane.b32.xlu0 %v2282_v0, %s2205_s4 }
  0x8a   : > { %v217_v5 = vpop.permute.xlu0 %216  ;;  %v779_v11 = vpop.permute.xlu1 %778 }
  0x8e   : > { %v219_v6 = vpop.permute.xlu0 %218  ;;  %v781_v12 = vpop.permute.xlu1 %780 }
  0x8f   : > { %v222_v7 = vsel %vm220_vm0, %v219_v6, %v217_v5  ;;  %v221_v8 = vsel %vm220_vm0, %v217_v5, %v219_v6  ;;  %v2330_v13 = vsel %vm782_vm4, %v779_v11, %v781_v12  ;;  %v2334_v14 = vsel %vm782_vm4, %v781_v12, %v779_v11 }
  0x90   : > { %223 = vrot.lane.b32.xlu0 %v222_v7, %s2205_s4  ;;  %225 = vrot.lane.b32.xlu1 %v221_v8, %s2205_s4  ;;  %v241_v9 = vsel %vm196_vm1, %v222_v7, 0.0  ;;  %v886_v58 = vsel %vm199_vm13, %v2334_v14, 0.0 }
  0x91   : > { %2016 = vmatprep.subr.msk.mxu0 %vm249_vm2, %v221_v8 }
  0x92   : > { %2017 = vmatpush1.msk.msra.mxu0 %vm249_vm2, %v241_v9  ;;  %v507_v15 = vpop.permute.xlu1 %506  ;;  %v505_v17 = vpop.permute.xlu0 %504  ;;  %v2046_v9 = vld [vmem:[%s2705_s1 + $0x20] sm:$0xf] }
  0x93   : > { %2018 = vmatmul.mubr.msk.f32.vlgmr.msra.gmra.mxu0 %vm245_vm3, %v2015_v10  ;;  %v508_v26 = vsel %vm227_vm6, %v505_v17, %v507_v15  ;;  %v509_v29 = vsel %vm227_vm6, %v507_v15, %v505_v17 }
  0x94   : > { %407 = vrot.lane.b32.xlu0 %v222_v7, %s2207_s7  ;;  %409 = vrot.lane.b32.xlu1 %v221_v8, %s2207_s7  ;;  %v515_v35 = vsel %vm2366_vm9, %v508_v26, 0.0  ;;  %v514_v38 = vsel %vm2349_vm5, %v509_v29, 0.0 }
  0x95   : > { %495 = vmatprep.mubr.f32.mxu0 %v2206_v3 }
  0x98   : > { %682 = vrot.lane.b32.xlu0 %v2282_v0, %s2207_s7  ;;  %684 = vrot.lane.b32.xlu1 %v2288_v1, %s2207_s7 }
  0x9c   : > { %785 = vrot.lane.b32.xlu0 %v2330_v13, %s2205_s4  ;;  %787 = vrot.lane.b32.xlu1 %v2334_v14, %s2205_s4 }
  0xa0   : > { %971 = vrot.lane.b32.xlu0 %v2330_v13, %s2207_s7  ;;  %973 = vrot.lane.b32.xlu1 %v2334_v14, %s2207_s7 }
 0x102   : > { %v226_v22 = vpop.permute.xlu1 %225  ;;  %v224_v23 = vpop.permute.xlu0 %223 }
 0x103   : > { %v229_v27 = vsel %vm227_vm6, %v226_v22, %v224_v23  ;;  %v228_v28 = vsel %vm227_vm6, %v224_v23, %v226_v22 }
 0x104   : > { %v235_v30 = vsel %vm2366_vm9, %v228_v28, 0.0  ;;  %v234_v31 = vsel %vm2358_vm7, %v229_v27, 0.0 }
 0x105   : > { %2019 = vmatprep.subr.msk.mxu1 %vm249_vm2, %v235_v30 }
 0x106   : > { %v410_v36 = vpop.permute.xlu1 %409  ;;  %2020 = vmatpush1.msk.msra.mxu1 %vm249_vm2, %v234_v31  ;;  %v408_v37 = vpop.permute.xlu0 %407 }
 0x107   : > { %v412_v39 = vsel %vm411_vm10, %v408_v37, %v410_v36  ;;  %v413_v40 = vsel %vm411_vm10, %v410_v36, %v408_v37  ;;  %2021 = vmatmul.mubr.msk.f32.vlgmr.msra.gmra.mxu1 %vm245_vm3, %v236_v32  ;;  %2027 = vmatprep.subr.msk.mxu1 %vm249_vm2, %v515_v35 }
 0x108   : > { %v418_v41 = vsel %vm2395_vm12, %v412_v39, 0.0  ;;  %v419_v42 = vsel %vm2387_vm11, %v413_v40, 0.0  ;;  %2028 = vmatpush1.msk.msra.mxu1 %vm249_vm2, %v514_v38  ;;  %591 = vmatprep.mubr.f32.mxu1 %v2206_v3 }
 0x109   : > { %2023 = vmatprep.subr.msk.mxu0 %vm249_vm2, %v419_v42 }
 0x10a   : > { %v685_v45 = vpop.permute.xlu1 %684  ;;  %2024 = vmatpush1.msk.msra.mxu0 %vm249_vm2, %v418_v41  ;;  %v683_v46 = vpop.permute.xlu0 %682 }
 0x10b   : > { %v686_v47 = vsel %vm411_vm10, %v683_v46, %v685_v45  ;;  %v687_v48 = vsel %vm411_vm10, %v685_v45, %v683_v46  ;;  %2025 = vmatmul.mubr.msk.f32.vlgmr.msra.gmra.mxu0 %vm245_vm3, %v2022_v43  ;;  %2029 = vmatmul.mubr.msk.f32.vlgmr.msra.gmra.mxu1 %vm245_vm3, %v2026_v44 }
 0x10c   : > { %v692_v49 = vsel %vm2362_vm8, %v686_v47, 0.0  ;;  %v693_v50 = vsel %vm2387_vm11, %v687_v48, 0.0  ;;  %2031 = vmatprep.subr.msk.mxu0 %vm249_vm2, %v2288_v1  ;;  %673 = vmatprep.mubr.f32.mxu0 %v2206_v3 }
 0x10d   : > { %2035 = vmatprep.subr.msk.mxu1 %vm249_vm2, %v693_v50  ;;  %2032 = vmatpush1.msk.msra.mxu0 %vm249_vm2, %v2282_v0 }
 0x10e   : > { %v788_v54 = vpop.permute.xlu1 %787  ;;  %2036 = vmatpush1.msk.msra.mxu1 %vm249_vm2, %v692_v49  ;;  %769 = vmatprep.mubr.f32.mxu1 %v2206_v3  ;;  %v786_v55 = vpop.permute.xlu0 %785 }
 0x10f   : > { %v789_v56 = vsel %vm227_vm6, %v786_v55, %v788_v54  ;;  %v790_v57 = vsel %vm227_vm6, %v788_v54, %v786_v55  ;;  %2033 = vmatmul.mubr.msk.f32.vlgmr.msra.gmra.mxu0 %vm245_vm3, %v2030_v51  ;;  %2037 = vmatmul.mubr.msk.f32.vlgmr.msra.gmra.mxu1 %vm245_vm3, %v2034_v52 }
 0x110   : > { %v795_v59 = vsel %vm2349_vm5, %v790_v57, 0.0  ;;  %v796_v60 = vsel %vm2451_vm14, %v789_v56, 0.0  ;;  %2043 = vmatprep.subr.msk.mxu1 %vm249_vm2, %v886_v58  ;;  %872 = vmatprep.mubr.f32.mxu0 %v2206_v3 }
 0x111   : > { %2044 = vmatpush1.msk.msra.mxu1 %vm249_vm2, %v2330_v13  ;;  %2039 = vmatprep.subr.msk.mxu0 %vm249_vm2, %v796_v60 }
 0x112   : > { %v974_v1 = vpop.permute.xlu1 %973  ;;  %2040 = vmatpush1.msk.msra.mxu0 %vm249_vm2, %v795_v59  ;;  %962 = vmatprep.mubr.f32.mxu1 %v2206_v3  ;;  %v972_v2 = vpop.permute.xlu0 %971 }
 0x113   : > { %v975_v5 = vsel %vm411_vm10, %v972_v2, %v974_v1  ;;  %v976_v6 = vsel %vm411_vm10, %v974_v1, %v972_v2  ;;  %2041 = vmatmul.mubr.msk.f32.vlgmr.msra.gmra.mxu0 %vm245_vm3, %v2038_v61  ;;  %2045 = vmatmul.mubr.msk.f32.vlgmr.msra.gmra.mxu1 %vm245_vm3, %v2042_v62 }
 0x114   : > { %v981_v7 = vsel %vm2362_vm8, %v975_v5, 0.0  ;;  %v982_v8 = vsel %vm2485_vm15, %v976_v6, 0.0  ;;  %1058 = vmatprep.mubr.f32.mxu0 %v2206_v3  ;;  %1183 = vmatprep.mubr.f32.mxu1 %v2206_v3 }
 0x115   : > { %2047 = vmatprep.subr.msk.mxu0 %vm249_vm2, %v982_v8 }
 0x116   : > { %2048 = vmatpush1.msk.msra.mxu0 %vm249_vm2, %v981_v7 }
 0x117   : > { %2049 = vmatmul.mubr.msk.f32.vlgmr.msra.gmra.mxu0 %vm245_vm3, %v2046_v9 }
 0x118   : > { %1263 = vmatprep.mubr.f32.mxu0 %v2206_v3 }
 0x153   : > { %v322_v10 = vpop.f32.mrf.mxu0 }
 0x155   : > { %v324_v12 = vpop.f32.mrf.mxu0 }
 0x1c7   : > { %v402_v11 = vpop.f32.mrf.mxu1 }
 0x1c8   : > { %v403_v14 = vadd.f32 %v402_v11, %v322_v10 }
 0x1c9   : > { %v404_v13 = vpop.f32.mrf.mxu1 }
 0x1ca   : > { %v405_v17 = vadd.f32 %v404_v13, %v324_v12 }
 0x1cb   : > { %v497_v15 = vpop.f32.mrf.mxu0  ;;  %v593_v16 = vpop.f32.mrf.mxu1 }
 0x1cc   : > { %v502_v19 = vadd.f32 %v497_v15, %v403_v14 }
 0x1cd   : > { %v499_v22 = vpop.f32.mrf.mxu0  ;;  %v595_v23 = vpop.f32.mrf.mxu1 }
 0x1ce   : > { %v598_v26 = vadd.f32 %v593_v16, %v502_v19  ;;  %v503_v27 = vadd.f32 %v499_v22, %v405_v17  ;;  %v2050_v22 = vld [vmem:[%s2706_s2 + $0x4] sm:$0xf] }
 0x1cf   : > { %v675_v28 = vpop.f32.mrf.mxu0  ;;  %v771_v29 = vpop.f32.mrf.mxu1 }
 0x1d0   : > { %v599_v30 = vadd.f32 %v595_v23, %v503_v27  ;;  %v680_v31 = vadd.f32 %v675_v28, %v598_v26 }
 0x1d1   : > { %v677_v32 = vpop.f32.mrf.mxu0  ;;  %v773_v35 = vpop.f32.mrf.mxu1 }
 0x1d2   : > { %v776_v36 = vadd.f32 %v771_v29, %v680_v31  ;;  %v681_v37 = vadd.f32 %v677_v32, %v599_v30 }
 0x1d3   : > { %v874_v38 = vpop.f32.mrf.mxu0  ;;  %v964_v39 = vpop.f32.mrf.mxu1 }
 0x1d4   : > { %v777_v40 = vadd.f32 %v773_v35, %v681_v37  ;;  %v879_v41 = vadd.f32 %v874_v38, %v776_v36 }
 0x1d5   : > { %v876_v42 = vpop.f32.mrf.mxu0  ;;  %v966_v45 = vpop.f32.mrf.mxu1 }
 0x1d6   : > { %v969_v43 = vadd.f32 %v964_v39, %v879_v41  ;;  %v880_v44 = vadd.f32 %v876_v42, %v777_v40  ;;  %v1105_v41 = vld [vmem:[%s2706_s2] sm:$0xf] }
 0x1d7   : > { %v1060_v46 = vpop.f32.mrf.mxu0 }
 0x1d8   : > { %v970_v47 = vadd.f32 %v966_v45, %v880_v44  ;;  %v1065_v48 = vadd.f32 %v1060_v46, %v969_v43 }
 0x1d9   : > { %v1062_v49 = vpop.f32.mrf.mxu0 }
 0x1da   : > { %v1066_v50 = vadd.f32 %v1062_v49, %v970_v47  ;;  %v1073_v51 = vmul.f32 %v1065_v48, %v1065_v48  ;;  %v1067_v52 = vsel %vm249_vm2, %v1065_v48, 0.0  ;;  %v2061_v49 = vld [vmem:[%s2706_s2 + $0xc] sm:$0xf] }
 0x1dc   : > { %v1068_v54 = vsel %vm249_vm2, %v1066_v50, 0.0  ;;  %v1074_v55 = vmul.f32 %v1066_v50, %v1066_v50  ;;  %v1075_v57 = vsel %vm249_vm2, %v1073_v51, 0.0 }
 0x1dd   : > { %v1069_v56 = vadd.f32 %v1068_v54, %v1067_v52 }
 0x1de   : > { %v1076_v58 = vsel %vm249_vm2, %v1074_v55, 0.0 }
 0x1df   : > { %1070 = vadd.xlane.f32.xlu0 %v1069_v56  ;;  %v1077_v59 = vadd.f32 %v1076_v58, %v1075_v57  ;;  %v2065_v56 = vld [vmem:[%s2706_s2 + $0x10] sm:$0xf]  ;;  %v2069_v57 = vld [vmem:[%s2706_s2 + $0x14] sm:$0xf] }
 0x1e1   : > { %1078 = vadd.xlane.f32.xlu1 %v1077_v59 }
 0x268   : > { %v1071_v60 = vpop.xlane.xlu0 %1070 }
 0x269   : > { %v1072_v61 = vmul.f32 0.00390625, %v1071_v60 }
 0x26a   : > { %v1079_v62 = vpop.xlane.xlu1 %1078 }
 0x26b   : > { %v1080_v1 = vmul.f32 0.00390625, %v1079_v62  ;;  %v1081_v2 = vmul.f32 %v1072_v61, %v1072_v61  ;;  %v1083_v7 = vsub.f32 %v1065_v48, %v1072_v61  ;;  %v1084_v8 = vsub.f32 %v1066_v50, %v1072_v61  ;;  %v2057_v48 = vld [vmem:[%s2706_s2 + $0x8] sm:$0xf] }
 0x26d   : > { %v1082_v5 = vsub.f32 %v1080_v1, %v1081_v2 }
 0x26f   : > { %v1085_v6 = vadd.f32 1e-05, %v1082_v5 }
 0x271   : > { %2137 = vrsqrt.f32 %v1085_v6 }
 0x27e   : > { %v2138_v9 = vpop.eup %2137 }
 0x27f   : > { %v1088_v10 = vmul.f32 %v2138_v9, %v1084_v8  ;;  %v1087_v11 = vmul.f32 %v2138_v9, %v1083_v7  ;;  %v2081_v9 = vld [vmem:[%s2706_s2 + $0x20] sm:$0xf] }
 0x281   : > { %v2514_v12 = vmax.f32 %v1088_v10, 0.0  ;;  %v2516_v13 = vmax.f32 %v1087_v11, 0.0 }
 0x283   : > { %1093 = vrot.lane.b32.xlu1 %v2514_v12, %s2203_s29  ;;  %1091 = vrot.lane.b32.xlu0 %v2516_v13, %s2203_s29  ;;  %s161_s29 = sand.u32 1, %s2193_s13  }
 0x284   : > { %s1935_s20 = scalar_lea.sflag [#allocation3], %s161_s29 }
 0x287   : > { %1632 = vrot.lane.b32.xlu1 %v2514_v12, %s2204_s30  ;;  %1630 = vrot.lane.b32.xlu0 %v2516_v13, %s2204_s30  ;;  %s2012_s30 = sshll.u32 %s161_s29, 3 }
 0x28b   : > { %1364 = vrot.lane.b32.xlu1 %v2514_v12, %s2205_s4  ;;  %1362 = vrot.lane.b32.xlu0 %v2516_v13, %s2205_s4 }
 0x2f5   : > { %v1094_v14 = vpop.permute.xlu1 %1093  ;;  %v1092_v15 = vpop.permute.xlu0 %1091 }
 0x2f6   : > { %v1096_v16 = vsel %vm220_vm0, %v1094_v14, %v1092_v15  ;;  %v1095_v17 = vsel %vm220_vm0, %v1092_v15, %v1094_v14 }
 0x2f7   : > { %1097 = vrot.lane.b32.xlu0 %v1096_v16, %s2205_s4  ;;  %v1106_v19 = vsel %vm196_vm1, %v1096_v16, 0.0  ;;  %1099 = vrot.lane.b32.xlu1 %v1095_v17, %s2205_s4 }
 0x2f8   : > { %2051 = vmatprep.subr.msk.mxu1 %vm249_vm2, %v1095_v17 }
 0x2f9   : > { %2052 = vmatpush1.msk.msra.mxu1 %vm249_vm2, %v1106_v19  ;;  %v1633_v23 = vpop.permute.xlu1 %1632  ;;  %v1631_v26 = vpop.permute.xlu0 %1630 }
 0x2fa   : > { %2053 = vmatmul.mubr.msk.f32.vlgmr.msra.gmra.mxu1 %vm245_vm3, %v2050_v22  ;;  %v1635_v27 = vsel %vm782_vm4, %v1633_v23, %v1631_v26  ;;  %v1634_v28 = vsel %vm782_vm4, %v1631_v26, %v1633_v23 }
 0x2fb   : > { %1270 = vrot.lane.b32.xlu0 %v1096_v16, %s2207_s7  ;;  %1272 = vrot.lane.b32.xlu1 %v1095_v17, %s2207_s7  ;;  %v1729_v59 = vsel %vm199_vm13, %v1635_v27, 0.0 }
 0x2fc   : > { %1353 = vmatprep.mubr.f32.mxu1 %v2206_v3 }
 0x2fd   : > { %v1365_v29 = vpop.permute.xlu1 %1364  ;;  %v1363_v30 = vpop.permute.xlu0 %1362 }
 0x2fe   : > { %v1366_v35 = vsel %vm227_vm6, %v1363_v30, %v1365_v29  ;;  %v1367_v38 = vsel %vm227_vm6, %v1365_v29, %v1363_v30 }
 0x2ff   : > { %1538 = vrot.lane.b32.xlu0 %v2516_v13, %s2207_s7  ;;  %1540 = vrot.lane.b32.xlu1 %v2514_v12, %s2207_s7  ;;  %v1369_v42 = vsel %vm2366_vm9, %v1366_v35, 0.0  ;;  %v1368_v21 = vsel %vm2349_vm5, %v1367_v38, 0.0 }
 0x303   : > { %1638 = vrot.lane.b32.xlu1 %v1635_v27, %s2205_s4  ;;  %1636 = vrot.lane.b32.xlu0 %v1634_v28, %s2205_s4  ;;  %s2091_s4 = sshll.u32 %s2250_s16, 7  ;;  %s2147_s16 = scalar_lea.vmem %s2146_s26, 256 }
 0x304   : > { %s1947_s19 = scalar_lea.hbm %s2707_s3, %s2091_s4 }
 0x307   : > { %1816 = vrot.lane.b32.xlu1 %v1635_v27, %s2207_s7  ;;  %1814 = vrot.lane.b32.xlu0 %v1634_v28, %s2207_s7  ;;  %s163_s7 = scalar_lea.vmem [#allocation2], %s2012_s30 }
 0x308   : > { %s1949_s10 = sshll.u32 %s163_s7, 4  ;;  %s1950_s10 = int_to_ptr.vmem [resolvable:$true] %s1949_s10 }
 0x309   : > { %s2141_s24 = scalar_lea.vmem %s1950_s10, 128  ;;  %p2148_p0 = scmp.lt.s32.totalorder %s1950_s10, %s2146_s26 }
 0x30a   : > { %p2142_p11 = scmp.ne.s32.totalorder %s1950_s10, %s2141_s24  ;;  %p2149_p1 = scmp.lt.s32.totalorder %s2147_s16, %s2141_s24 }
 0x30c   : > { %p2143_p12 = pnand %p2142_p11, %p2267_p5  ;;  %p2150_p2 = por %p2149_p1, %p2148_p0 }
 0x30e   : > { %p2144_p13 = pneg %p2143_p12 }
 0x310   : > { %p2151_p3 = pnand %p2150_p2, %p2144_p13 }
 0x369   : > { %v1100_v31 = vpop.permute.xlu1 %1099  ;;  %v1098_v32 = vpop.permute.xlu0 %1097 }
 0x36a   : > { %v1101_v36 = vsel %vm227_vm6, %v1098_v32, %v1100_v31  ;;  %v1102_v37 = vsel %vm227_vm6, %v1100_v31, %v1098_v32 }
 0x36b   : > { %v1103_v39 = vsel %vm2358_vm7, %v1102_v37, 0.0  ;;  %v1104_v40 = vsel %vm2366_vm9, %v1101_v36, 0.0 }
 0x36c   : > { %2054 = vmatprep.subr.msk.mxu0 %vm249_vm2, %v1104_v40 }
 0x36d   : > { %v1273_v43 = vpop.permute.xlu1 %1272  ;;  %2055 = vmatpush1.msk.msra.mxu0 %vm249_vm2, %v1103_v39  ;;  %v1271_v44 = vpop.permute.xlu0 %1270 }
 0x36e   : > { %v1274_v45 = vsel %vm411_vm10, %v1271_v44, %v1273_v43  ;;  %v1275_v46 = vsel %vm411_vm10, %v1273_v43, %v1271_v44  ;;  %2062 = vmatprep.subr.msk.mxu0 %vm249_vm2, %v1369_v42  ;;  %2056 = vmatmul.mubr.msk.f32.vlgmr.msra.gmra.mxu0 %vm245_vm3, %v1105_v41 }
 0x36f   : > { %v1276_v25 = vsel %vm2395_vm12, %v1274_v45, 0.0  ;;  %v1277_v47 = vsel %vm2387_vm11, %v1275_v46, 0.0  ;;  %2063 = vmatpush1.msk.msra.mxu0 %vm249_vm2, %v1368_v21  ;;  %1445 = vmatprep.mubr.f32.mxu0 %v2206_v3 }
 0x370   : > { %2058 = vmatprep.subr.msk.mxu1 %vm249_vm2, %v1277_v47 }
 0x371   : > { %v1541_v50 = vpop.permute.xlu1 %1540  ;;  %2059 = vmatpush1.msk.msra.mxu1 %vm249_vm2, %v1276_v25  ;;  %v1539_v34 = vpop.permute.xlu0 %1538 }
 0x372   : > { %v1542_v51 = vsel %vm411_vm10, %v1539_v34, %v1541_v50  ;;  %v1543_v52 = vsel %vm411_vm10, %v1541_v50, %v1539_v34  ;;  %2060 = vmatmul.mubr.msk.f32.vlgmr.msra.gmra.mxu1 %vm245_vm3, %v2057_v48  ;;  %2066 = vmatprep.subr.msk.mxu1 %vm249_vm2, %v2514_v12 }
 0x373   : > { %v1544_v54 = vsel %vm2362_vm8, %v1542_v51, 0.0  ;;  %v1545_v55 = vsel %vm2387_vm11, %v1543_v52, 0.0  ;;  %2064 = vmatmul.mubr.msk.f32.vlgmr.msra.gmra.mxu0 %vm245_vm3, %v2061_v49  ;;  %2067 = vmatpush1.msk.msra.mxu1 %vm249_vm2, %v2516_v13 }
 0x374   : > { %2070 = vmatprep.subr.msk.mxu0 %vm249_vm2, %v1545_v55  ;;  %1529 = vmatprep.mubr.f32.mxu1 %v2206_v3 }
 0x375   : > { %v1639_v58 = vpop.permute.xlu1 %1638  ;;  %2071 = vmatpush1.msk.msra.mxu0 %vm249_vm2, %v1544_v54  ;;  %v1637_v33 = vpop.permute.xlu0 %1636  ;;  %1621 = vmatprep.mubr.f32.mxu0 %v2206_v3 }
 0x376   : > { %v1640_v60 = vsel %vm227_vm6, %v1637_v33, %v1639_v58  ;;  %v1641_v61 = vsel %vm227_vm6, %v1639_v58, %v1637_v33  ;;  %2068 = vmatmul.mubr.msk.f32.vlgmr.msra.gmra.mxu1 %vm245_vm3, %v2065_v56  ;;  %2078 = vmatprep.subr.msk.mxu0 %vm249_vm2, %v1729_v59 }
 0x377   : > { %v1642_v62 = vsel %vm2349_vm5, %v1641_v61, 0.0  ;;  %v1643_v1 = vsel %vm2451_vm14, %v1640_v60, 0.0  ;;  %2072 = vmatmul.mubr.msk.f32.vlgmr.msra.gmra.mxu0 %vm245_vm3, %v2069_v57  ;;  %1719 = vmatprep.mubr.f32.mxu1 %v2206_v3 }
 0x378   : > { %2079 = vmatpush1.msk.msra.mxu0 %vm249_vm2, %v1634_v28  ;;  %2074 = vmatprep.subr.msk.mxu1 %vm249_vm2, %v1643_v1 }
 0x379   : > { %v1817_v2 = vpop.permute.xlu1 %1816  ;;  %2075 = vmatpush1.msk.msra.mxu1 %vm249_vm2, %v1642_v62  ;;  %v1815_v53 = vpop.permute.xlu0 %1814  ;;  %1805 = vmatprep.mubr.f32.mxu0 %v2206_v3 }
 0x37a   : > { %v1818_v5 = vsel %vm411_vm10, %v1815_v53, %v1817_v2  ;;  %v1819_v6 = vsel %vm411_vm10, %v1817_v2, %v1815_v53  ;;  %2076 = vmatmul.mubr.msk.f32.vlgmr.msra.gmra.mxu1 %vm245_vm3, %v2073_v18 }
 0x37b   : > { %v1820_v7 = vsel %vm2362_vm8, %v1818_v5, 0.0  ;;  %v1821_v8 = vsel %vm2485_vm15, %v1819_v6, 0.0  ;;  %2080 = vmatmul.mubr.msk.f32.vlgmr.msra.gmra.mxu0 %vm245_vm3, %v2077_v20  ;;  %1897 = vmatprep.mubr.f32.mxu1 %v2206_v3 }
 0x37c   : > { %2082 = vmatprep.subr.msk.mxu1 %vm249_vm2, %v1821_v8 }
 0x37d   : > { %2083 = vmatpush1.msk.msra.mxu1 %vm249_vm2, %v1820_v7 }
 0x37e   : > { %2084 = vmatmul.mubr.msk.f32.vlgmr.msra.gmra.mxu1 %vm245_vm3, %v2081_v9 }
 0x3ba   : > { %v1185_v4 = vpop.f32.mrf.mxu1 }
 0x3bc   : > { %v1187_v10 = vpop.f32.mrf.mxu1 }
 0x42e   : > { %v1265_v24 = vpop.f32.mrf.mxu0 }
 0x42f   : > { %v1266_v63 = vadd.f32 %v1265_v24, %v1185_v4 }
 0x430   : > { %v1267_v11 = vpop.f32.mrf.mxu0 }
 0x431   : > { %v1268_v13 = vadd.f32 %v1267_v11, %v1187_v10 }
 0x432   : > { %v1355_v12 = vpop.f32.mrf.mxu1 }
 0x433   : > { %v1360_v14 = vadd.f32 %v1355_v12, %v1266_v63  ;;  %v1447_v15 = vpop.f32.mrf.mxu0 }
 0x434   : > { %v1357_v3 = vpop.f32.mrf.mxu1 }
 0x435   : > { %v1361_v16 = vadd.f32 %v1357_v3, %v1268_v13  ;;  %v1452_v17 = vadd.f32 %v1447_v15, %v1360_v14  ;;  %v1449_v19 = vpop.f32.mrf.mxu0 }
 0x436   : > { %v1531_v22 = vpop.f32.mrf.mxu1 }
 0x437   : > { %v1453_v23 = vadd.f32 %v1449_v19, %v1361_v16  ;;  %v1536_v26 = vadd.f32 %v1531_v22, %v1452_v17  ;;  %v1623_v27 = vpop.f32.mrf.mxu0 }
 0x438   : > { %v1533_v28 = vpop.f32.mrf.mxu1 }
 0x439   : > { %v1537_v29 = vadd.f32 %v1533_v28, %v1453_v23  ;;  %v1628_v30 = vadd.f32 %v1623_v27, %v1536_v26  ;;  %v1625_v31 = vpop.f32.mrf.mxu0 }
 0x43a   : > { %v1721_v32 = vpop.f32.mrf.mxu1 }
 0x43b   : > { %v1629_v35 = vadd.f32 %v1625_v31, %v1537_v29  ;;  %v1726_v36 = vadd.f32 %v1721_v32, %v1628_v30  ;;  %v1807_v37 = vpop.f32.mrf.mxu0 }
 0x43c   : > { %v1723_v38 = vpop.f32.mrf.mxu1 }
 0x43d   : > { %v1727_v39 = vadd.f32 %v1723_v38, %v1629_v35  ;;  %v1812_v40 = vadd.f32 %v1807_v37, %v1726_v36  ;;  %v1809_v41 = vpop.f32.mrf.mxu0 }
 0x43e   : > { %v1899_v42 = vpop.f32.mrf.mxu1 }
 0x43f   : > { %v1813_v43 = vadd.f32 %v1809_v41, %v1727_v39  ;;  %v1904_v44 = vadd.f32 %v1899_v42, %v1812_v40 }
 0x440   : > { %v1901_v21 = vpop.f32.mrf.mxu1 }
 0x441   : > { %v1905_v45 = vadd.f32 %v1901_v21, %v1813_v43  ;;  %v1912_v46 = vmul.f32 %v1904_v44, %v1904_v44  ;;  %v1906_v25 = vsel %vm249_vm2, %v1904_v44, 0.0 }
 0x443   : > { %v1907_v47 = vsel %vm249_vm2, %v1905_v45, 0.0  ;;  %v1913_v48 = vmul.f32 %v1905_v45, %v1905_v45  ;;  %v1914_v50 = vsel %vm249_vm2, %v1912_v46, 0.0 }
 0x444   : > { %v1908_v49 = vadd.f32 %v1907_v47, %v1906_v25 }
 0x445   : > { %v1915_v34 = vsel %vm249_vm2, %v1913_v48, 0.0 }
 0x446   : > { %1909 = vadd.xlane.f32.xlu0 %v1908_v49  ;;  %v1916_v51 = vadd.f32 %v1915_v34, %v1914_v50 }
 0x448   : > { %1917 = vadd.xlane.f32.xlu1 %v1916_v51 }
 0x4cf   : > { %v1910_v52 = vpop.xlane.xlu0 %1909 }
 0x4d0   : > { %v1911_v54 = vmul.f32 0.00390625, %v1910_v52 }
 0x4d1   : > { %v1918_v55 = vpop.xlane.xlu1 %1917 }
 0x4d2   : > { %v1919_v56 = vmul.f32 0.00390625, %v1918_v55  ;;  %v1920_v57 = vmul.f32 %v1911_v54, %v1911_v54  ;;  %v1922_v59 = vsub.f32 %v1904_v44, %v1911_v54  ;;  %v1923_v60 = vsub.f32 %v1905_v45, %v1911_v54 }
 0x4d4   : > { %v1921_v58 = vsub.f32 %v1919_v56, %v1920_v57 }
 0x4d6   : > { %v1924_v33 = vadd.f32 1e-05, %v1921_v58 }
 0x4d8   : > { %2139 = vrsqrt.f32 %v1924_v33 }
 0x4e5   : > { %v2140_v61 = vpop.eup %2139 }
 0x4e6   : > { %v1926_v62 = vmul.f32 %v2140_v61, %v1922_v59  ;;  %v1927_v1 = vmul.f32 %v2140_v61, %v1923_v60 }
 0x4e8   : > { %v1930_v18 = vcombine.low %v1926_v62, %v1927_v1 }
 0x4ea   : > { %v1932_v20 = vadd.f32 %v1930_v18, %v2282_v0 }
 0x4ec   : > { %1933 = vst [vmem:[%s163_s7] sm:$0xff] %v1932_v20 }
 0x4ed   : > { %2154 = shalt.err (!%p2151_p3)
}
 0x4ee   : > { %s2155_s27 = scalar_lea.hbm %s1947_s19, 128  ;;  %s2159_s6 = scalar_lea.hbm %s2707_s3, 256 }
 0x4ef   : > { %p2156_p4 = scmp.ne.s32.totalorder %s1947_s19, %s2155_s27  ;;  %p2160_p9 = scmp.lt.s32.totalorder %s1947_s19, %s2707_s3 }
 0x4f0   : > { %p2161_p10 = scmp.lt.s32.totalorder %s2159_s6, %s2155_s27 }
 0x4f1   : > { %p2157_p7 = pnand %p2156_p4, %p2267_p5 }
 0x4f2   : > { %p2162_p11 = por %p2161_p10, %p2160_p9 }
 0x4f3   : > { %p2158_p8 = pneg %p2157_p7 }
 0x4f5   : > { %p2163_p12 = pnand %p2162_p11, %p2158_p8 }
 0x4f7   : > { %2166 = shalt.err (!%p2163_p12)
}
 0x4f8   : > { %2092 = dma.vmem_to_hbm [thread:$0]  (%p2267_p5), %s1950_s10, 128, %s1947_s19, %s1935_s20  }
 0x4f9 PF: > { %p2098_p13 = scmp.ge.s32.totalorder %s2201_s15, 2  ;;  %s1961_s29 = sand.u32 1, %s2189_s12  }
 0x4fa   : > { %s1962_s30 = scalar_lea.sflag [#allocation3], %s1961_s29 }
 0x4fb   : > { %p2095_p0 = pnand %p2098_p13, %p2271_p6 }
 0x4fd   : > { %p2096_p1 = pneg %p2095_p0 }
 0x4ff   : > { %2184 = dma.done.wait (%p2096_p1), %s1962_s30, 128  }
 0x500   : > { %2186 = vsyncadd (%p2096_p1), %s1962_s30, 4294967168  ;;  %p13_p2 = scmp.ge.s32.totalorder %s2254_s18, 4   ;;  %s2726_s12 = smov %s2193_s13 }
 0x501   : > { %s2727_s13 = smov %s2197_s14  ;;  %s2728_s14 = smov %s2265_s21 }
 0x502   : > { %s2729_s15 = smov %s2254_s18  ;;  %15 = sbr.rel (!%p13_p2) target bundleno = 3 (0x3), region = 83 }
 0x507   :  { %1967 = vsyncpa [#allocation3], 1 }
 0x508   :  { %1969 = vsyncpa [#allocation3 + $0x1], 1 }

</bundles_post_ra>
